<compile_context>
chip_gen: v5e
topology: v5e:2x2
jax: 0.10.0
libtpu: 0.0.40
codegen_flags: <defaults>
</compile_context>

<pallas_src>
import functools
import math

import jax
import jax.numpy as jnp
from jax.experimental import pallas as pl
from jax.experimental.pallas import tpu as pltpu


def _round_up(x, m):
    return ((x + m - 1) // m) * m


def _pick_divisor_tile(full, step, cap):
    """Largest multiple of `step` that divides `full` and is <= cap (>= step)."""
    if full <= cap:
        return full
    t = (cap // step) * step
    while t > step and full % t:
        t -= step
    return max(t, step)


def _vmem_budget():
    """Generation-aware (vmem_limit_bytes, tile_budget_bytes)."""
    phys = None
    try:
        info = pltpu.get_tpu_info()
        for attr in ("vmem_capacity_bytes", "vmem_bytes", "vmem_size_bytes"):
            if hasattr(info, attr):
                phys = int(getattr(info, attr))
                break
    except Exception:
        phys = None
    if phys is None or phys <= 0:
        phys = 64 * 1024 * 1024                  # conservative: v7x per-TC VMEM
    if phys >= 100 * 1024 * 1024:                # v5e / v6e: 128 MiB physical
        vmem_limit = 96 * 1024 * 1024
    else:                                        # v7x: 64 MiB per TC
        vmem_limit = 48 * 1024 * 1024
    return vmem_limit, vmem_limit - 8 * 1024 * 1024   # headroom for compiler scratch


_TM_CAP = 512
_TN_CAP = 512


def _choose_tiles(B, O, I, dtype, tile_budget):
    """Tile sizes + padded dims.  Prefers nk == 1 (K fully resident)."""
    isz = jnp.dtype(dtype).itemsize
    sub = max(8, 32 // isz)                      # sublane packing: 8 f32 / 16 bf16 / 32 int8
    B_s = _round_up(max(B, 1), sub)
    O_128 = _round_up(max(O, 1), 128)
    I_128 = _round_up(max(I, 1), 128)

    tm = _pick_divisor_tile(B_s, sub, _TM_CAP)
    tn = _pick_divisor_tile(O_128, 128, _TN_CAP)

    out_dbl = 2 * tm * tn * isz                  # double-buffered output block
    if 2 * (tm + tn) * I_128 * isz + out_dbl <= tile_budget:
        tk = I_128                               # nk == 1: whole reduction resident
    else:
        avail = tile_budget - out_dbl - tm * tn * 4      # + f32 acc scratch (nk > 1)
        tk_cap = max(128, (avail // (2 * (tm + tn) * isz)) // 128 * 128)
        tk = _pick_divisor_tile(I_128, 128, tk_cap)
    return tm, tn, tk, B_s, O_128, I_128


# ----------------------------------------------------------------------------
# Kernel bodies
# ----------------------------------------------------------------------------

def _matmul_direct(x_ref, w_ref, o_ref):
    # x_ref [tm, tk] contracted with w_ref [tn, tk] on the MXU (no W transpose);
    # f32 accumulation lands directly in the output block (nk == 1 path).
    o_ref[...] = jax.lax.dot_general(
        x_ref[...], w_ref[...],
        dimension_numbers=(((1,), (1,)), ((), ())),
        preferred_element_type=jnp.float32,
    ).astype(o_ref.dtype)


def _matmul_acc(x_ref, w_ref, o_ref, acc_ref, *, k_axis):
    # nk > 1 path: f32 VMEM accumulator, zeroed at k==0, stored at k==last.
    @pl.when(pl.program_id(k_axis) == 0)
    def _init():
        acc_ref[...] = jnp.zeros_like(acc_ref)

    acc_ref[...] += jax.lax.dot_general(
        x_ref[...], w_ref[...],
        dimension_numbers=(((1,), (1,)), ((), ())),
        preferred_element_type=jnp.float32,
    )

    @pl.when(pl.program_id(k_axis) == pl.num_programs(k_axis) - 1)
    def _store():
        o_ref[...] = acc_ref[...].astype(o_ref.dtype)


def _kernel_direct_single(midx_ref, x_ref, w_ref, o_ref):
    del midx_ref  # consumed only by the weight index_map (scalar prefetch)
    _matmul_direct(x_ref, w_ref, o_ref)


def _kernel_acc_single(midx_ref, x_ref, w_ref, o_ref, acc_ref, *, k_axis):
    del midx_ref
    _matmul_acc(x_ref, w_ref, o_ref, acc_ref, k_axis=k_axis)


# ----------------------------------------------------------------------------
# Wrappers
# ----------------------------------------------------------------------------

def _pad_x3(x, B_p, I_p):
    B, _, I = x.shape
    if B == B_p and I == I_p:
        return x
    return jnp.pad(x, ((0, B_p - B), (0, 0), (0, I_p - I)))


def _pad_last2(a, rows, cols):
    r, c = a.shape[-2], a.shape[-1]
    if r == rows and c == cols:
        return a
    pad = [(0, 0)] * (a.ndim - 2) + [(0, rows - r), (0, cols - c)]
    return jnp.pad(a, pad)


def _ein_linear_all(x, weight, tile_budget_override=None):
    """x [B, E, I], weight [E, O, I] -> [B, E, O] (batch-major, no transposes)."""
    B, E, I = x.shape
    Ew, O, Iw = weight.shape
    assert Ew == E and Iw == I

    dtype = x.dtype
    isz = jnp.dtype(dtype).itemsize
    vmem_limit, tile_budget = _vmem_budget()
    if tile_budget_override is not None:
        tile_budget = tile_budget_override

    tm, tn, tk, B_p, O_p, I_p = _choose_tiles(B, O, I, dtype, tile_budget)
    nb, no, nk = B_p // tm, O_p // tn, I_p // tk

    # Pad only when needed.  (Weight padding is ideally hoisted to init by
    # callers that reuse the module; here it is a no-op for aligned shapes.)
    x_p = _pad_x3(x, B_p, I_p)
    w_p = _pad_last2(weight, O_p, I_p)
    # Free (layout-preserving) reshape: keeps batch-major layout, gives the
    # kernel 2-D lane/sublane-aligned blocks; column block index = e*nk + k.
    x2 = x_p.reshape(B_p, E * I_p)

    # Grid ordering: pick the innermost parallel axis that minimises the
    # re-streamed-operand traffic; order the outer parallel axes largest-first
    # (better 2-TensorCore balance on v7x when E is small).
    x_bytes = B_p * E * I_p * isz
    w_bytes = E * O_p * I_p * isz
    if nk == 1:
        if no * x_bytes + w_bytes <= x_bytes + nb * w_bytes:
            inner = "b"                      # W block resident across B tiles
            x_reads, w_reads = no, 1
        else:
            inner = "n"                      # x block resident across O tiles
            x_reads, w_reads = 1, nb
    else:
        inner = "b" if nb >= no else "n"
        x_reads, w_reads = no, nb

    extents = {"e": E, "b": nb, "n": no}
    outer = sorted((a for a in extents if a != inner),
                   key=lambda a: extents[a], reverse=True)
    axes = tuple(outer) + (inner,)
    if nk > 1:
        axes = axes + ("k",)
        extents["k"] = nk
    pos = {a: i for i, a in enumerate(axes)}
    grid = tuple(extents[a] for a in axes)
    semantics = tuple("arbitrary" if a == "k" else "parallel" for a in axes)

    def x_map(*idx):
        k = idx[pos["k"]] if nk > 1 else 0
        return (idx[pos["b"]], idx[pos["e"]] * nk + k)

    def w_map(*idx):
        k = idx[pos["k"]] if nk > 1 else 0
        return (idx[pos["e"]], idx[pos["n"]], k)

    def o_map(*idx):
        return (idx[pos["b"]], idx[pos["e"]] * no + idx[pos["n"]])

    if nk == 1:
        kernel = _matmul_direct
        scratch = []
    else:
        kernel = functools.partial(_matmul_acc, k_axis=len(axes) - 1)
        scratch = [pltpu.VMEM((tm, tn), jnp.float32)]

    cost = pl.CostEstimate(
        flops=2 * E * B_p * O_p * I_p,
        transcendentals=0,
        bytes_accessed=x_reads * x_bytes + w_reads * w_bytes + B_p * E * O_p * isz,
    )

    out2 = pl.pallas_call(
        kernel,
        out_shape=jax.ShapeDtypeStruct((B_p, E * O_p), dtype),
        grid_spec=pltpu.PrefetchScalarGridSpec(
            num_scalar_prefetch=0,
            grid=grid,
            in_specs=[
                pl.BlockSpec((tm, tk), x_map),                   # x2 [B_p, E*I_p]
                pl.BlockSpec((pl.Squeezed(), tn, tk), w_map),    # W  [E, O_p, I_p]
            ],
            out_specs=pl.BlockSpec((tm, tn), o_map),             # out [B_p, E*O_p]
            scratch_shapes=scratch,
        ),
        compiler_params=pltpu.CompilerParams(
            dimension_semantics=semantics,
            vmem_limit_bytes=vmem_limit,
        ),
        cost_estimate=cost,
    )(x2, w_p)

    out = out2.reshape(B_p, E, O_p)          # free reshape back to [B, E, O]
    if B_p != B or O_p != O:
        out = out[:B, :, :O]
    return out


def _ein_linear_single(x, weight, model_idx, tile_budget_override=None):
    """x [B, I] @ W[model_idx].T -> [B, O]; model picked via scalar prefetch."""
    B, I = x.shape
    E, O, Iw = weight.shape
    assert Iw == I

    dtype = x.dtype
    isz = jnp.dtype(dtype).itemsize
    vmem_limit, tile_budget = _vmem_budget()
    if tile_budget_override is not None:
        tile_budget = tile_budget_override

    tm, tn, tk, B_p, O_p, I_p = _choose_tiles(B, O, I, dtype, tile_budget)
    nb, no, nk = B_p // tm, O_p // tn, I_p // tk

    x_p = _pad_last2(x, B_p, I_p)
    w_p = _pad_last2(weight, O_p, I_p)

    x_bytes = B_p * I_p * isz
    w_bytes = O_p * I_p * isz
    if nk == 1:
        if no * x_bytes + w_bytes <= x_bytes + nb * w_bytes:
            inner = "b"
            x_reads, w_reads = no, 1
        else:
            inner = "n"
            x_reads, w_reads = 1, nb
    else:
        inner = "b" if nb >= no else "n"
        x_reads, w_reads = no, nb

    extents = {"b": nb, "n": no}
    axes = tuple(a for a in extents if a != inner) + (inner,)
    if nk > 1:
        axes = axes + ("k",)
        extents["k"] = nk
    pos = {a: i for i, a in enumerate(axes)}
    grid = tuple(extents[a] for a in axes)
    semantics = tuple("arbitrary" if a == "k" else "parallel" for a in axes)
    ngrid = len(axes)

    def x_map(*args):
        idx = args[:ngrid]
        k = idx[pos["k"]] if nk > 1 else 0
        return (idx[pos["b"]], k)

    def w_map(*args):
        idx, midx = args[:ngrid], args[-1]
        k = idx[pos["k"]] if nk > 1 else 0
        return (midx[0], idx[pos["n"]], k)

    def o_map(*args):
        idx = args[:ngrid]
        return (idx[pos["b"]], idx[pos["n"]])

    if nk == 1:
        kernel = _kernel_direct_single
        scratch = []
    else:
        kernel = functools.partial(_kernel_acc_single, k_axis=ngrid - 1)
        scratch = [pltpu.VMEM((tm, tn), jnp.float32)]

    cost = pl.CostEstimate(
        flops=2 * B_p * O_p * I_p,
        transcendentals=0,
        bytes_accessed=x_reads * x_bytes + w_reads * w_bytes + B_p * O_p * isz,
    )

    midx = jnp.asarray(model_idx, dtype=jnp.int32).reshape((1,))

    out = pl.pallas_call(
        kernel,
        out_shape=jax.ShapeDtypeStruct((B_p, O_p), dtype),
        grid_spec=pltpu.PrefetchScalarGridSpec(
            num_scalar_prefetch=1,               # model index lives in SMEM
            grid=grid,
            in_specs=[
                pl.BlockSpec((tm, tk), x_map),                   # x [B_p, I_p]
                pl.BlockSpec((pl.Squeezed(), tn, tk), w_map),    # W [E, O_p, I_p]
            ],
            out_specs=pl.BlockSpec((tm, tn), o_map),             # out [B_p, O_p]
            scratch_shapes=scratch,
        ),
        compiler_params=pltpu.CompilerParams(
            dimension_semantics=semantics,
            vmem_limit_bytes=vmem_limit,
        ),
        cost_estimate=cost,
    )(midx, x_p, w_p)

    if B_p != B or O_p != O:
        out = out[:B, :O]
    return out


def ein_linear(x, weight, model_idx=None, *, _tile_budget=None):
    """Pallas EinLinear forward.

    x      : [B, E, I] (model_idx None) or [B, I] (model_idx given)
    weight : [E, O, I]
    """
    if model_idx is not None:
        return _ein_linear_single(x, weight, model_idx, _tile_budget)
    return _ein_linear_all(x, weight, _tile_budget)


def init_ein_linear_weight(key, n_models, in_features, out_features,
                           dtype=jnp.float32):
    # Matches nn.init.kaiming_uniform_(w, a=sqrt(5)) per model:
    # bound = sqrt(6 / ((1 + a^2) * fan_in)) = 1 / sqrt(fan_in)
    bound = 1.0 / math.sqrt(in_features)
    return jax.random.uniform(
        key, (n_models, out_features, in_features),
        minval=-bound, maxval=bound, dtype=dtype)


if __name__ == "__main__":
    key = jax.random.PRNGKey(0)

    # --- small shapes matching the module's typical use -----------------
    n_models, in_features, out_features = 4, 32, 16
    batch = 8
    k_w, k_x, k_w2, k_x2 = jax.random.split(key, 4)

    weight = init_ein_linear_weight(k_w, n_models, in_features, out_features)
    x = jax.random.normal(k_x, (batch, n_models, in_features), dtype=jnp.float32)

    # main path (model_idx=None)
    out = jax.block_until_ready(ein_linear(x, weight))
    ref = jnp.einsum('eoi,bei->beo', weight, x)
    assert out.shape == (batch, n_models, out_features)
    assert jnp.allclose(out, ref, atol=1e-5, rtol=1e-5)

    # model_idx path (scalar-prefetch model selection)
    x_single = x[:, 0, :]                                     # [B, I]
    out_single = jax.block_until_ready(ein_linear(x_single, weight, model_idx=2))
    ref_single = x_single @ weight[2].T
    assert out_single.shape == (batch, out_features)
    assert jnp.allclose(out_single, ref_single, atol=1e-5, rtol=1e-5)

    # --- non-tile-multiple shapes: exercises O padding, nk == 1 full-K path
    E2, B2, I2, O2 = 2, 16, 640, 24
    w2 = init_ein_linear_weight(k_w2, E2, I2, O2)
    x2 = jax.random.normal(k_x2, (B2, E2, I2), dtype=jnp.float32)
    out2 = jax.block_until_ready(ein_linear(x2, w2))
    ref2 = jnp.einsum('eoi,bei->beo', w2, x2)
    assert out2.shape == (B2, E2, O2)
    assert jnp.allclose(out2, ref2, atol=1e-3, rtol=1e-3)

    # --- force the nk > 1 multi-step-K accumulation path via a tiny tile
    #     budget (exercises the acc-scratch kernels on both code paths) ----
    out3 = jax.block_until_ready(ein_linear(x2, w2, _tile_budget=256 * 1024))
    assert jnp.allclose(out3, ref2, atol=1e-3, rtol=1e-3)

    out4 = jax.block_until_ready(
        ein_linear(x2[:, 1, :], w2, model_idx=1, _tile_budget=256 * 1024))
    assert jnp.allclose(out4, x2[:, 1, :] @ w2[1].T, atol=1e-3, rtol=1e-3)

    print("KERNEL_OK")
</pallas_src>

<mosaic_0001>
module attributes {stable_mosaic.version = 11 : i64} {
  func.func @_matmul_direct(%arg0: i32, %arg1: i32, %arg2: i32, %arg3: memref<8x128xf32, #tpu.memory_space<vmem>>, %arg4: memref<1x128x128xf32, #tpu.memory_space<vmem>>, %arg5: memref<8x128xf32, #tpu.memory_space<vmem>>) attributes {dimension_semantics = [#tpu.dimension_semantics<parallel>, #tpu.dimension_semantics<parallel>, #tpu.dimension_semantics<parallel>], iteration_bounds = array<i64: 4, 1, 1>, scalar_prefetch = 0 : i64, scratch_operands = 0 : i64, tpu.core_type = #tpu.core_type<tc>, window_params = [{transform_indices = @transform_0, window_bounds = array<i64: 8, 128>}, {transform_indices = @transform_1, window_bounds = array<i64: 1, 128, 128>}, {transform_indices = @transform_2, window_bounds = array<i64: 8, 128>}]} {
    %c0 = arith.constant 0 : index
    %c0_0 = arith.constant 0 : index
    %0 = vector.load %arg3[%c0, %c0_0] : memref<8x128xf32, #tpu.memory_space<vmem>>, vector<8x128xf32>
    %c0_1 = arith.constant 0 : index
    %c0_2 = arith.constant 0 : index
    %c0_3 = arith.constant 0 : index
    %1 = vector.load %arg4[%c0_1, %c0_2, %c0_3] : memref<1x128x128xf32, #tpu.memory_space<vmem>>, vector<1x128x128xf32>
    %2 = vector.shape_cast %1 : vector<1x128x128xf32> to vector<128x128xf32>
    %cst = arith.constant dense<0.000000e+00> : vector<8x128xf32>
    %3 = tpu.matmul %0, %2, %cst {dimension_numbers = #tpu.dot_dimension_numbers<[1], [1], [0], [0], [0, 0, 1, 0], [], []>} : vector<8x128xf32>, vector<128x128xf32>, vector<8x128xf32> -> vector<8x128xf32>
    %c0_4 = arith.constant 0 : index
    %c0_5 = arith.constant 0 : index
    %4 = vector.load %arg5[%c0_4, %c0_5] : memref<8x128xf32, #tpu.memory_space<vmem>>, vector<8x128xf32>
    tpu.vector_store %arg5[%c0_4, %c0_5], %3 {strides = array<i32>} : memref<8x128xf32, #tpu.memory_space<vmem>>, vector<8x128xf32>,
    return
  }
  func.func @transform_0(%arg0: i32, %arg1: i32, %arg2: i32) -> (i32, i32) {
    %c1_i32 = arith.constant 1 : i32
    %0 = arith.muli %arg0, %c1_i32 : i32
    %c0_i32 = arith.constant 0 : i32
    %1 = arith.addi %0, %c0_i32 : i32
    %c0_i32_0 = arith.constant 0 : i32
    return %arg2, %1 : i32, i32
  }
  func.func @transform_1(%arg0: i32, %arg1: i32, %arg2: i32) -> (i32, i32, i32) {
    %c0_i32 = arith.constant 0 : i32
    %c0_i32_0 = arith.constant 0 : i32
    return %arg0, %arg1, %c0_i32 : i32, i32, i32
  }
  func.func @transform_2(%arg0: i32, %arg1: i32, %arg2: i32) -> (i32, i32) {
    %c1_i32 = arith.constant 1 : i32
    %0 = arith.muli %arg0, %c1_i32 : i32
    %1 = arith.addi %0, %arg1 : i32
    %c0_i32 = arith.constant 0 : i32
    return %arg2, %1 : i32, i32
  }
}

</mosaic_0001>

<bundles_post_ra>
// kernel: tpu_custom_call.1
= control target key start
LH: loop header
LB: loop body
LE: loop exit
PB: predicated region body
PF: predicated region fallthrough
CT: control target
= control target key end

     0   :  { %7 = vsyncpa [#allocation3], 0  ;;  %s824_s0 = inlined_call_operand.hbm [shape: f32[8,512], index: 0, kind: input, shape index: {}]   ;;  %s825_s1 = inlined_call_operand.hbm [shape: f32[4,128,128], index: 1, kind: input, shape index: {}]   ;;  %s826_s2 = inlined_call_operand.hbm [shape: f32[8,512], index: 2, kind: output, shape index: {}]  }
   0x1   :  { %9 = vsyncpa [#allocation3 + $0x1], 0 }
   0x2   :  { %10 = vsyncpa [#allocation6], 0 }
   0x3   :  { %12 = vsyncpa [#allocation6 + $0x1], 0 }
   0x4   :  { %13 = vsyncpa [#allocation4], 0 }
   0x5   :  { %15 = vsyncpa [#allocation4 + $0x1], 0  ;;  %s657_s9 = smov 0   ;;  %s659_s10 = smov 0  }
   0x6   :  { %s661_s11 = smov 0   ;;  %s663_s12 = smov 0  }
   0x7   :  { %s665_s13 = smov 0   ;;  %s667_s14 = smov 0  }
   0x8 LB: > { %s405_s15 = sadd.s32 4294967295, %s638_s14   ;;  %s406_s16 = sadd.s32 4294967294, %s638_s14   ;;  %s638_s14 = sphi %s667_s14, %s21_s14   ;;  %s634_s13 = sphi %s665_s13, %s836_s13   ;;  %s630_s12 = sphi %s663_s12, %s835_s12   ;;  %s626_s11 = sphi %s661_s11, %s834_s11   ;;  %s622_s10 = sphi %s659_s10, %s833_s10   ;;  %s618_s9 = sphi %s657_s9, %s832_s9  }
   0x9   : > { %s40_s17 = sadd.s32 1, %s634_s13  ;;  %s49_s18 = sadd.s32 1, %s626_s11 }
   0xa   : > { %p42_p0 = scmp.ge.s32.totalorder %s40_s17, 4  ;;  %p56_p1 = scmp.ne.s32.totalorder %s626_s11, %s622_s10 }
   0xb   : > { %p57_p2 = scmp.eq.s32.totalorder %s638_s14, 0  ;;  %p62_p3 = scmp.ne.s32.totalorder %s622_s10, %s618_s9 }
   0xc   : > { %s838_s17 = smov (%p42_p0, %s40_s17), 0  ;;  %p63_p5 = scmp.eq.s32.totalorder %s405_s15, 0 }
   0xd   : > { %p698_p4 = por %p57_p2, %p56_p1  ;;  %s45_s20 = ssub.s32 %s634_s13, %s838_s17 }
   0xe   : > { %p118_p6 = scmp.eq.s32.totalorder %s405_s15, 3  ;;  %p47_p7 = scmp.eq.s32.totalorder %s45_s20, 0 }
   0xf   : > { %p704_p8 = por %p63_p5, %p62_p3  ;;  %p124_p10 = scmp.eq.s32.totalorder %s406_s16, 3 }
  0x10   : > { %p708_p9 = por %p118_p6, %p56_p1  ;;  %p440_p12 = scmp.lt.s32.totalorder %s638_s14, 4 }
  0x11   : > { %s713_s23 = scalar_select %p47_p7, %s626_s11, %s49_s18  }
  0x12   : > { %p715_p11 = por %p124_p10, %p62_p3  ;;  %s721_s25 = sand.u32 1, %s626_s11  }
  0x13   : > { %s409_s26 = sshll.u32 %s721_s25, 3  ;;  %s410_s27 = sshll.u32 %s634_s13, 3 }
  0x14   : > { %s154_s30 = scalar_lea.hbm %s824_s0, %s410_s27  ;;  %s148_s3 = scalar_lea.vmem [#allocation2], %s409_s26 }
  0x15   : > { %s158_s4 = sshll.u32 %s148_s3, 4  ;;  %s156_s5 = sshll.u32 %s154_s30, 4  ;;  %s159_s4 = int_to_ptr.vmem [resolvable:$true] %s158_s4  ;;  %s157_s5 = int_to_ptr.hbm [resolvable:$true] %s156_s5 }
  0x16   : > { %p730_p13 = pnand %p440_p12, %p698_p4  ;;  %p414_p0 = scmp.ge.s32.totalorder %s638_s14, 1 }
  0x17   : > { %p187_p1 = scmp.lt.s32.totalorder %s638_s14, 5  ;;  %s145_s7 = scalar_lea.sflag [#allocation3], %s721_s25 }
  0x18   : > { %432 = dma.hbm_to_vmem [thread:$0]  (!%p730_p13), %s157_s5, 128, %s159_s4, %s145_s7  }
  0x19   : > { %p188_p2 = pnand %p414_p0, %p187_p1  ;;  %s411_s8 = sshll.u32 %s721_s25, 7 }
  0x1a   : > { %s422_s15 = sshll.u32 %s634_s13, 7  ;;  %s169_s26 = scalar_lea.vmem [#allocation5], %s411_s8 }
  0x1b   : > { %s176_s20 = scalar_lea.hbm %s825_s1, %s422_s15  ;;  %s179_s19 = sshll.u32 %s169_s26, 4  ;;  %s180_s19 = int_to_ptr.vmem [resolvable:$true] %s179_s19 }
  0x1c   : > { %s177_s27 = sshll.u32 %s176_s20, 4  ;;  %s166_s28 = scalar_lea.sflag [#allocation6], %s721_s25  ;;  %s178_s27 = int_to_ptr.hbm [resolvable:$true] %s177_s27 }
  0x1d   : > { %s640_s29 = smov 128   ;;  %s641_s30 = smov 8  }
  0x1e   : > { %435 = dma.hbm_to_vmem [thread:$0]  (!%p730_p13), %s178_s27, 2048, %s180_s19, %s166_s28, %s640_s29, %s640_s29, %s641_s30  }
  0x1f   : > { %191 = sbr.rel (%p188_p2) target bundleno = 233 (0xe9), region = 28  ;;  %s748_s3 = sand.u32 (!%p188_p2), 1, %s622_s10  }
  0x20   : > { %s415_s4 = sshll.u32 (!%p188_p2), %s748_s3, 3  ;;  %s194_s5 = scalar_lea.sflag (!%p188_p2), [#allocation3], %s748_s3 }
  0x21   : > { %s754_s7 = scalar_lea.vmem (!%p188_p2), [#allocation2], %s415_s4 }
  0x24   : > { %605 = dma.done.wait (%p704_p8), %s194_s5, 128  }
  0x25   : > { %607 = vsyncadd (%p704_p8), %s194_s5, 4294967168  ;;  %s416_s25 = sshll.u32 %s748_s3, 7  ;;  %s204_s6 = scalar_lea.sflag [#allocation6], %s748_s3 }
  0x26   : > { %s762_s8 = scalar_lea.vmem [#allocation5], %s416_s25 }
  0x27   : > { %609 = dma.done.wait (%p704_p8), %s204_s6, 2048  }
  0x28   : > { %611 = vsyncadd (%p704_p8), %s204_s6, 4294965248  ;;  %v252_v0 = vld [vmem:[%s762_s8 + $0x78] sm:$0xff]  ;;  %v251_v1 = vld [vmem:[%s762_s8 + $0x70] sm:$0xff]  ;;  %s419_s21 = sshll.u32 %s630_s12, 3  ;;  %s233_s20 = scalar_lea.vmem [#allocation7], %s415_s4 }
  0x29   : > { %253 = vmatpush.xpose.msra.mxu0 %v252_v0  ;;  %v250_v2 = vld [vmem:[%s762_s8 + $0x68] sm:$0xff]  ;;  %v249_v3 = vld [vmem:[%s762_s8 + $0x60] sm:$0xff]  ;;  %v248_v4 = vld [vmem:[%s762_s8 + $0x58] sm:$0xff]  ;;  %s288_s18 = scalar_lea.hbm %s826_s2, %s419_s21  ;;  %s290_s26 = sshll.u32 %s233_s20, 4  ;;  %s291_s26 = int_to_ptr.vmem [resolvable:$true] %s290_s26 }
  0x2a   : > { %v247_v5 = vld [vmem:[%s762_s8 + $0x50] sm:$0xff]  ;;  %v246_v6 = vld [vmem:[%s762_s8 + $0x48] sm:$0xff]  ;;  %v245_v7 = vld [vmem:[%s762_s8 + $0x40] sm:$0xff]  ;;  %s292_s19 = sshll.u32 %s288_s18, 4  ;;  %s275_s27 = scalar_lea.sflag [#allocation4], %s748_s3  ;;  %s293_s19 = int_to_ptr.hbm [resolvable:$true] %s292_s19 }
  0x2b   : > { %v244_v8 = vld [vmem:[%s762_s8 + $0x38] sm:$0xff]  ;;  %v243_v9 = vld [vmem:[%s762_s8 + $0x30] sm:$0xff]  ;;  %v242_v10 = vld [vmem:[%s762_s8 + $0x28] sm:$0xff]  ;;  %s566_s28 = sshra.s32 %s293_s19, 4  ;;  %s572_s5 = scalar_lea.hbm %s826_s2, 32  ;;  %s567_s28 = int_to_ptr.hbm [resolvable:$true] %s566_s28 }
  0x2c   : > { %v241_v11 = vld [vmem:[%s762_s8 + $0x20] sm:$0xff]  ;;  %v240_v12 = vld [vmem:[%s762_s8 + $0x18] sm:$0xff]  ;;  %v239_v13 = vld [vmem:[%s762_s8 + $0x10] sm:$0xff]  ;;  %s568_s29 = scalar_lea.hbm %s567_s28, 8  ;;  %p573_p6 = scmp.lt.s32.totalorder %s567_s28, %s826_s2 }
  0x2d   : > { %254 = vmatpush.xpose.msra.mxu0 %v251_v1  ;;  %v238_v14 = vld [vmem:[%s762_s8 + $0x8] sm:$0xff]  ;;  %v237_v15 = vld [vmem:[%s762_s8] sm:$0xff]  ;;  %v236_v16 = vld [vmem:[%s754_s7] sm:$0xff]  ;;  %p569_p3 = scmp.ne.s32.totalorder %s567_s28, %s568_s29  ;;  %p574_p7 = scmp.lt.s32.totalorder %s572_s5, %s568_s29 }
  0x2f   : > { %p570_p4 = pnand %p569_p3, %p708_p9  ;;  %p575_p8 = por %p574_p7, %p573_p6 }
  0x31   : > { %255 = vmatpush.xpose.msra.mxu0 %v250_v2  ;;  %p571_p5 = pneg %p570_p4 }
  0x33   : > { %p576_p10 = pnand %p575_p8, %p571_p5 }
  0x35   : > { %256 = vmatpush.xpose.msra.mxu0 %v249_v3 }
  0x39   : > { %257 = vmatpush.xpose.msra.mxu0 %v248_v4 }
  0x3d   : > { %258 = vmatpush.xpose.msra.mxu0 %v247_v5 }
  0x41   : > { %259 = vmatpush.xpose.msra.mxu0 %v246_v6 }
  0x45   : > { %260 = vmatpush.xpose.msra.mxu0 %v245_v7 }
  0x49   : > { %261 = vmatpush.xpose.msra.mxu0 %v244_v8 }
  0x4d   : > { %262 = vmatpush.xpose.msra.mxu0 %v243_v9 }
  0x51   : > { %263 = vmatpush.xpose.msra.mxu0 %v242_v10 }
  0x55   : > { %264 = vmatpush.xpose.msra.mxu0 %v241_v11 }
  0x59   : > { %265 = vmatpush.xpose.msra.mxu0 %v240_v12 }
  0x5d   : > { %266 = vmatpush.xpose.msra.mxu0 %v239_v13 }
  0x61   : > { %267 = vmatpush.xpose.msra.mxu0 %v238_v14 }
  0x65   : > { %268 = vmatpush.xpose.msra.mxu0 %v237_v15 }
  0x68   : > { %269 = vmatmul.f32.vlgmr.msra.gmra.mxu0 %v236_v16 }
  0xe5   : > { %v270_v17 = vpop.f32.mrf.mxu0 }
  0xe6   : > { %273 = vst [vmem:[%s233_s20] sm:$0xff] %v270_v17 }
  0xe7   : > { %579 = shalt.err (!%p576_p10)
}
  0xe8   : > { %427 = dma.vmem_to_hbm [thread:$0]  (%p708_p9), %s291_s26, 128, %s293_s19, %s275_s27  }
  0xe9 PF: > { %p441_p12 = scmp.ge.s32.totalorder %s638_s14, 2  ;;  %s304_s3 = sand.u32 1, %s618_s9  }
  0xea   : > { %s305_s25 = scalar_lea.sflag [#allocation4], %s304_s3 }
  0xeb   : > { %p437_p13 = pnand %p441_p12, %p715_p11 }
  0xed   : > { %p438_p0 = pneg %p437_p13 }
  0xef   : > { %613 = dma.done.wait (%p438_p0), %s305_s25, 128  }
  0xf0   : > { %615 = vsyncadd (%p438_p0), %s305_s25, 4294967168  ;;  %s21_s14 = sadd.s32 1, %s638_s14   ;;  %s832_s9 = smov %s622_s10 }
  0xf1   : > { %p18_p1 = scmp.ge.s32.totalorder %s21_s14, 6   ;;  %s833_s10 = smov %s626_s11 }
  0xf2   : > { %s834_s11 = smov %s713_s23  ;;  %s835_s12 = smov %s634_s13 }
  0xf3   : > { %s836_s13 = smov %s838_s17  ;;  %20 = sbr.rel (!%p18_p1) target bundleno = 8 (0x8), region = 86 }
  0xf8   :  { %311 = vsyncpa [#allocation3], 1 }
  0xf9   :  { %313 = vsyncpa [#allocation3 + $0x1], 1 }
  0xfa   :  { %314 = vsyncpa [#allocation6], 1 }
  0xfb   :  { %316 = vsyncpa [#allocation6 + $0x1], 1 }
  0xfc   :  { %317 = vsyncpa [#allocation4], 1 }
  0xfd   :  { %319 = vsyncpa [#allocation4 + $0x1], 1 }

</bundles_post_ra>
